<compile_context>
chip_gen: v6e
topology: v6e:2x2x1
jax: 0.10.0
libtpu: 0.0.40
codegen_flags: <defaults>
</compile_context>

<pallas_src>
import jax
import jax.numpy as jnp
from jax.experimental import pallas as pl
from jax.experimental.pallas import tpu as pltpu


def _linear_head_kernel(x_ref, w_ref, b_ref, o_ref):
    """One row-block of the linear head.

    x_ref : (TM, F)    VMEM  input rows
    w_ref : (1, F)     VMEM  nn.Linear weight (out_features = 1)
    b_ref : (1,)       SMEM  bias (scalar)
    o_ref : (1, 1, TM) VMEM  lane-dense output (one logit per input row)
    """
    x = x_ref[...].astype(jnp.float32)          # (TM, F)
    w = w_ref[...].astype(jnp.float32)          # (1, F) broadcasts over rows
    # VPU multiply + cross-lane reduce; f32 accumulation. No MXU, no w.T.
    r = jnp.sum(x * w, axis=-1)                 # (TM,)
    r = r + b_ref[0]                            # scalar bias from SMEM
    o_ref[...] = r[None, None, :].astype(o_ref.dtype)


def _round_up(x, m):
    return ((x + m - 1) // m) * m


def useful_score_regressor_linear_baseline(meta_feats, weight, bias, *, row_block=None):
    """logits = meta_feats @ weight.T + bias  (== nn.Linear(F -> 1)).

    meta_feats: (B, F); weight: (1, F); bias: (1,).  Returns (B, 1).
    """
    B, F = meta_feats.shape
    out_dtype = meta_feats.dtype
    bias1d = jnp.asarray(bias, jnp.float32).reshape(1)

    if row_block is None:
        # ~4 MiB per input block (x2 for double buffering on the grid path).
        budget = 4 * 1024 * 1024
        row_block = max(512, min(8192, (budget // max(F * 4, 1)) // 512 * 512))

    if B <= row_block:
        # Single block: gridless call -> no pipelining machinery, no double buffer.
        tm = _round_up(max(B, 1), 8)
        b_pad = tm
        x = meta_feats if b_pad == B else jnp.pad(meta_feats, ((0, b_pad - B), (0, 0)))
        out = pl.pallas_call(
            _linear_head_kernel,
            out_shape=jax.ShapeDtypeStruct((1, 1, tm), out_dtype),
            in_specs=[
                pl.BlockSpec(memory_space=pltpu.MemorySpace.VMEM),
                pl.BlockSpec(memory_space=pltpu.MemorySpace.VMEM),
                pl.BlockSpec(memory_space=pltpu.MemorySpace.SMEM),
            ],
            out_specs=pl.BlockSpec(memory_space=pltpu.MemorySpace.VMEM),
        )(x, weight, bias1d)
    else:
        # Row-tiled, HBM-bandwidth-bound path.
        tm = _round_up(row_block, 128)          # lane-dense output, sublane-aligned rows
        g = pl.cdiv(B, tm)
        b_pad = g * tm
        x = meta_feats if b_pad == B else jnp.pad(meta_feats, ((0, b_pad - B), (0, 0)))
        out = pl.pallas_call(
            _linear_head_kernel,
            out_shape=jax.ShapeDtypeStruct((g, 1, tm), out_dtype),
            grid_spec=pltpu.PrefetchScalarGridSpec(
                num_scalar_prefetch=0,
                grid=(g,),
                in_specs=[
                    pl.BlockSpec((tm, F), lambda i: (i, 0)),
                    pl.BlockSpec((1, F), lambda i: (0, 0)),
                    pl.BlockSpec(memory_space=pltpu.MemorySpace.SMEM),
                ],
                out_specs=pl.BlockSpec((1, 1, tm), lambda i: (i, 0, 0)),
            ),
            compiler_params=pltpu.CompilerParams(
                dimension_semantics=("parallel",)),
        )(x, weight, bias1d)

    # (G, 1, TM) -> (B_pad, 1) -> drop padded rows.
    return out.reshape(b_pad, 1)[:B]


if __name__ == "__main__":
    key = jax.random.PRNGKey(0)
    kx, kw, kb, kx2 = jax.random.split(key, 4)

    F = 32  # num_meta_feats
    bound = 1.0 / jnp.sqrt(jnp.float32(F))
    weight = jax.random.uniform(kw, (1, F), jnp.float32, -bound, bound)
    bias = jax.random.uniform(kb, (1,), jnp.float32, -bound, bound)

    # Small batch (gridless path).
    B = 8
    meta_feats = jax.random.normal(kx, (B, F), dtype=jnp.float32)
    logits = jax.block_until_ready(
        useful_score_regressor_linear_baseline(meta_feats, weight, bias))
    ref = meta_feats @ weight.T + bias
    assert logits.shape == (B, 1)
    assert jnp.allclose(logits, ref, atol=1e-5, rtol=1e-5)

    # Larger, non-multiple batch exercising the tiled grid path + padding + slicing.
    B2 = 1000
    meta2 = jax.random.normal(kx2, (B2, F), dtype=jnp.float32)
    logits2 = jax.block_until_ready(
        useful_score_regressor_linear_baseline(meta2, weight, bias, row_block=256))
    ref2 = meta2 @ weight.T + bias
    assert logits2.shape == (B2, 1)
    assert jnp.allclose(logits2, ref2, atol=1e-5, rtol=1e-5)

    print("KERNEL_OK")
</pallas_src>

<mosaic_0001>
module attributes {stable_mosaic.version = 11 : i64} {
  func.func @_linear_head_kernel(%arg0: memref<8x32xf32, #tpu.memory_space<vmem>>, %arg1: memref<1x32xf32, #tpu.memory_space<vmem>>, %arg2: memref<1xf32, #tpu.memory_space<smem>>, %arg3: memref<1x1x8xf32, #tpu.memory_space<vmem>>) attributes {dimension_semantics = [], scalar_prefetch = 0 : i64, scratch_operands = 0 : i64, tpu.core_type = #tpu.core_type<tc>} {
    %c0 = arith.constant 0 : index
    %c0_0 = arith.constant 0 : index
    %0 = vector.load %arg0[%c0, %c0_0] : memref<8x32xf32, #tpu.memory_space<vmem>>, vector<8x32xf32>
    %c0_1 = arith.constant 0 : index
    %c0_2 = arith.constant 0 : index
    %1 = vector.load %arg1[%c0_1, %c0_2] : memref<1x32xf32, #tpu.memory_space<vmem>>, vector<1x32xf32>
    %2 = vector.broadcast %1 : vector<1x32xf32> to vector<8x32xf32>
    %3 = arith.mulf %0, %2 : vector<8x32xf32>
    %cst = arith.constant dense<0.000000e+00> : vector<8xf32>
    %4 = vector.multi_reduction <add>, %3, %cst [1] : vector<8x32xf32> to vector<8xf32>
    %c0_3 = arith.constant 0 : index
    %5 = memref.load %arg2[%c0_3] : memref<1xf32, #tpu.memory_space<smem>>
    %6 = vector.broadcast %5 : f32 to vector<8xf32>
    %7 = arith.addf %4, %6 : vector<8xf32>
    %8 = vector.shape_cast %7 : vector<8xf32> to vector<1x1x8xf32>
    %c0_4 = arith.constant 0 : index
    %c0_5 = arith.constant 0 : index
    %c0_6 = arith.constant 0 : index
    %9 = vector.load %arg3[%c0_4, %c0_5, %c0_6] : memref<1x1x8xf32, #tpu.memory_space<vmem>>, vector<1x1x8xf32>
    tpu.vector_store %arg3[%c0_4, %c0_5, %c0_6], %8 {strides = array<i32>} : memref<1x1x8xf32, #tpu.memory_space<vmem>>, vector<1x1x8xf32>,
    return
  }
}

</mosaic_0001>

<bundles_post_ra>
// kernel: tpu_custom_call.1
= control target key start
LH: loop header
LB: loop body
LE: loop exit
PB: predicated region body
PF: predicated region fallthrough
CT: control target
= control target key end

     0   :  { %9 = vsyncpa [#allocation4], 0  ;;  %s150_s0 = inlined_call_operand.hbm [shape: f32[8,32], index: 0, kind: input, shape index: {}]   ;;  %s151_s1 = inlined_call_operand.vmem [shape: f32[1,32], index: 1, kind: input, shape index: {}]   ;;  %s152_s2 = inlined_call_operand.<no memory space> [shape: f32[1], index: 2, kind: input, shape index: {}]   ;;  %s153_s3 = inlined_call_operand.hbm [shape: f32[1,1,8], index: 3, kind: output, shape index: {}]  }
   0x1   :  { %10 = vsyncpa [#allocation5], 0  ;;  %s116_s12 = smov [#allocation3]  }
   0x2   :  { %s17_s13 = sshll.u32 %s116_s12, 4  ;;  %s18_s13 = int_to_ptr.vmem [resolvable:$true] %s17_s13 }
   0x3   :  { %s80_s14 = scalar_lea.vmem %s18_s13, 128  ;;  %p85_p1 = scmp.lt.s32.totalorder %s18_s13, %s18_s13 }
   0x4   :  { %p81_p0 = scmp.ne.s32.totalorder %s18_s13, %s80_s14  ;;  %p86_p2 = scmp.lt.s32.totalorder %s80_s14, %s80_s14 }
   0x6   :  { %p87_p3 = por %p86_p2, %p85_p1 }
   0x8   :  { %p88_p4 = pnand %p87_p3, %p81_p0 }
   0xa   :  { %91 = shalt.err (!%p88_p4)
}
   0xb   :  { %20 = dma.hbm_to_vmem [thread:$0]  %s150_s0, 128, %s18_s13, [#allocation4]  }
   0xc   :  { %112 = dma.done.wait [#allocation4], 128  }
   0xd   :  { %113 = vsyncadd [#allocation4], 4294967168  ;;  %v28_v0 = vld [vmem:[#allocation3] sm:$0xff]  ;;  %vm37_vm0 = vcmask 261120   ;;  %v45_v4 = vlaneseq  ;;  %v42_v7 = vstv %s152_s2  ;;  %s117_s0 = smov [#allocation6]   ;;  %vm52_vm1 = vcmask 57344  }
   0xe   :  { %v69_v1 = vld [vmem:[%s151_s1] ss:$0 sm:$0xff]  ;;  %s60_s21 = sshll.u32 %s117_s0, 4  ;;  %s61_s21 = int_to_ptr.vmem [resolvable:$true] %s60_s21 }
   0xf   :  { %v36_v2 = vmul.f32 %v69_v1, %v28_v0  ;;  %v46_v5 = vand.u32 127, %v45_v4  ;;  %v48_v6 = vshrl.u32 %v45_v4, 7  ;;  %s92_s1 = scalar_lea.vmem %s61_s21, 16  ;;  %s96_s22 = scalar_lea.vmem %s61_s21, 32 }
  0x10   :  { %p93_p5 = scmp.ne.s32.totalorder %s61_s21, %s92_s1  ;;  %p97_p6 = scmp.lt.s32.totalorder %s61_s21, %s61_s21 }
  0x11   :  { %v38_v3 = vsel %vm37_vm0, %v36_v2, 0.0  ;;  %v49_v8 = vsub.s32 %v46_v5, %v48_v6  ;;  %p98_p7 = scmp.lt.s32.totalorder %s96_s22, %s92_s1 }
  0x12   :  { %39 = vadd.xlane.f32.xlu0 %v38_v3 }
  0x13   :  { %p99_p8 = por %p98_p7, %p97_p6 }
  0x15   :  { %p100_p9 = pnand %p99_p8, %p93_p5 }
  0x9b   :  { %v40_v9 = vpop.xlane.xlu0 %39 }
  0x9c   :  { %v43_v10 = vadd.f32 %v42_v7, %v40_v9 }
  0x9e   :  { %v50_v11 = vrot.slane %v43_v10, %v49_v8 }
  0xa0   :  { %53 = vst.msk [vmem:[#allocation6] sm:$0x1] %vm52_vm1, %v50_v11 }
  0xa1   :  { %103 = shalt.err (!%p100_p9)
}
  0xa2   :  { %63 = dma.vmem_to_hbm [thread:$0]  %s61_s21, 16, %s153_s3, [#allocation5]  }
  0xa3   :  { %114 = dma.done.wait [#allocation5], 16  }
  0xa4   :  { %115 = vsyncadd [#allocation5], 4294967280 }
  0xa5   :  { %67 = vsyncpa [#allocation4], 1 }
  0xa6   :  { %68 = vsyncpa [#allocation5], 1 }

</bundles_post_ra>
